<compile_context>
chip_gen: v5e
topology: v5e:2x2
jax: 0.10.0
libtpu: 0.0.40
codegen_flags: <defaults>
</compile_context>

<pallas_src>
import functools

import jax
import jax.numpy as jnp
from jax.experimental import pallas as pl
from jax.experimental.pallas import tpu as pltpu


def _scse_kernel(x_ref, w1_ref, b1_ref, w2t_ref, b2_ref, wsp_ref, out_ref, *,
                 inv_hw):
    """Block shapes:
         x    (Bt, C, HWp)  HWp is lane-aligned (mult of 128); padded tail is 0
         w1   (R, C)        first Linear weight (torch (out, in) layout)
         b1   (1, R)
         w2t  (R, C)        second Linear weight, pre-transposed on the host
         b2   (1, C)
         wsp  (C, 1)        spatial-SE 1x1 conv weight
         out  (Bt, C, HWp)
    """
    f32 = jnp.float32

    # ---- channel squeeze: global average pool over spatial (lane reduce) ----
    # Padded lanes are zero, so dividing the sum by the *true* HW is exact.
    pooled = jnp.sum(x_ref[...].astype(f32), axis=-1) * inv_hw           # (Bt, C)

    # ---- channel excitation MLP: VPU broadcast-mul + XLU reduce (no MXU) ----
    h = jnp.sum(pooled[:, None, :] * w1_ref[...][None, :, :], axis=-1)   # (Bt, R)
    h = jnp.maximum(h + b1_ref[...], 0.0)
    z = jnp.sum(h[:, :, None] * w2t_ref[...][None, :, :], axis=1)        # (Bt, C)
    chn = 1.0 / (1.0 + jnp.exp(-(z + b2_ref[...])))     # exact sigmoid (tiny)

    # ---- spatial excitation: 1x1 conv = VPU mul + XLU sublane reduce ----
    spa_z = jnp.sum(x_ref[...].astype(f32) * wsp_ref[...][None, :, :],
                    axis=1, keepdims=True)                               # (Bt, 1, HWp)
    # exp already lives on the EUP; approx reciprocal keeps the HW-sized
    # divide off the VALU as well.
    spa = pl.reciprocal(1.0 + jnp.exp(-spa_z), approx=True)

    # ---- out = x*chn + x*spa = x * (chn + spa) ----
    gate = chn[:, :, None] + spa                                         # (Bt, C, HWp)
    out_ref[...] = (x_ref[...] * gate).astype(out_ref.dtype)


def scse_forward(x_nchw, w1, b1, w2, b2, w_sp, *,
                 target_block_bytes=2 << 20, max_block_bytes=8 << 20):
    """SCSEBlock.forward.

    x_nchw: (B, C, H, W)
    w1:     (R, C)  first Linear weight (torch layout), R = C // reduction
    b1:     (R,)    first Linear bias
    w2:     (C, R)  second Linear weight (torch layout)
    b2:     (C,)    second Linear bias
    w_sp:   (1, C, 1, 1) spatial-SE 1x1 conv weight (bias=False)
    returns (B, C, H, W)
    """
    B, C, H, W = x_nchw.shape
    R = w1.shape[0]
    HW = H * W
    HWp = ((HW + 127) // 128) * 128          # lane-align -> unmasked vst stores
    elem = jnp.dtype(x_nchw.dtype).itemsize

    x_flat = x_nchw.reshape(B, C, HW)
    if HWp != HW:
        x_flat = jnp.pad(x_flat, ((0, 0), (0, 0), (0, HWp - HW)))

    # --- batch blocking: ~2 MiB x blocks for DMA efficiency, <= 8 MiB so
    # double-buffered in+out stays well under v7x's 64 MiB VMEM, and at most
    # cdiv(B, 2) images per block so >= 2 "parallel" grid steps exist for the
    # two v7x TensorCores. Partial trailing batch blocks are safe: every image
    # is processed independently and Pallas clips out-of-range writes.
    img_bytes = C * HWp * elem
    bt = max(1, target_block_bytes // img_bytes)
    bt = max(1, min(bt, max_block_bytes // img_bytes))
    if B >= 2:
        bt = min(bt, pl.cdiv(B, 2))
    bt = int(min(bt, B))
    grid_b = pl.cdiv(B, bt)

    # Weight layouts: keep C on the lane axis everywhere; transpose W2 on the
    # host so the kernel needs no in-kernel relayouts.
    b1_row = b1.reshape(1, R)
    w2t = w2.T                                # (R, C)
    b2_row = b2.reshape(1, C)
    wsp_col = w_sp.reshape(C, 1)

    block_bytes = bt * img_bytes
    vmem_limit = int(min(48 << 20, max(32 << 20, 6 * block_bytes)))

    kernel = functools.partial(_scse_kernel, inv_hw=1.0 / HW)

    out_flat = pl.pallas_call(
        kernel,
        out_shape=jax.ShapeDtypeStruct((B, C, HWp), x_nchw.dtype),
        grid_spec=pltpu.PrefetchScalarGridSpec(
            num_scalar_prefetch=0,
            grid=(grid_b,),
            in_specs=[
                pl.BlockSpec((bt, C, HWp), lambda b: (b, 0, 0)),   # x block
                pl.BlockSpec((R, C), lambda b: (0, 0)),            # W1
                pl.BlockSpec((1, R), lambda b: (0, 0)),            # b1
                pl.BlockSpec((R, C), lambda b: (0, 0)),            # W2^T
                pl.BlockSpec((1, C), lambda b: (0, 0)),            # b2
                pl.BlockSpec((C, 1), lambda b: (0, 0)),            # w_sp
            ],
            out_specs=pl.BlockSpec((bt, C, HWp), lambda b: (b, 0, 0)),
        ),
        compiler_params=pltpu.CompilerParams(
            dimension_semantics=("parallel",),
            vmem_limit_bytes=vmem_limit),
    )(x_flat, w1, b1_row, w2t, b2_row, wsp_col)

    if HWp != HW:
        out_flat = out_flat[:, :, :HW]
    return out_flat.reshape(B, C, H, W)


def _reference(x, w1, b1, w2, b2, w_sp):
    """Pure-JAX reference of SCSEBlock.forward for validation."""
    pooled = jnp.mean(x, axis=(2, 3))                               # (B, C)
    h = jax.nn.relu(pooled @ w1.T + b1)                             # (B, R)
    chn = jax.nn.sigmoid(h @ w2.T + b2)                             # (B, C)
    chn_se = x * chn[:, :, None, None]
    spa = jax.nn.sigmoid(jnp.einsum('bchw,c->bhw', x, w_sp.reshape(-1)))
    spa_se = x * spa[:, None, :, :]
    return chn_se + spa_se


if __name__ == "__main__":
    key = jax.random.PRNGKey(0)
    ks = jax.random.split(key, 6)

    # channel=32 with the module's default reduction=16 -> hidden dim R=2
    B, C, H, W = 2, 32, 16, 16
    reduction = 16
    R = C // reduction

    x = jax.random.normal(ks[0], (B, C, H, W), dtype=jnp.float32)

    # nn.Linear default init ~ U(-1/sqrt(fan_in), 1/sqrt(fan_in))
    lim1 = 1.0 / jnp.sqrt(float(C))
    w1 = jax.random.uniform(ks[1], (R, C), jnp.float32, -lim1, lim1)
    b1 = jax.random.uniform(ks[2], (R,), jnp.float32, -lim1, lim1)
    lim2 = 1.0 / jnp.sqrt(float(R))
    w2 = jax.random.uniform(ks[3], (C, R), jnp.float32, -lim2, lim2)
    b2 = jax.random.uniform(ks[4], (C,), jnp.float32, -lim2, lim2)
    limc = 1.0 / jnp.sqrt(float(C))
    w_sp = jax.random.uniform(ks[5], (1, C, 1, 1), jnp.float32, -limc, limc)

    out = jax.block_until_ready(scse_forward(x, w1, b1, w2, b2, w_sp))
    ref = jax.block_until_ready(_reference(x, w1, b1, w2, b2, w_sp))
    assert out.shape == ref.shape
    err = float(jnp.max(jnp.abs(out - ref)))
    # tolerance covers the approx EUP reciprocal used for the spatial gate
    assert err < 1e-2, f"max abs err {err}"

    # Second config: non-lane-aligned spatial (14x14 -> padded to 256 lanes)
    # plus an odd batch, exercising the HW-pad path and a partial batch block.
    B2, H2, W2 = 3, 14, 14
    x2 = jax.random.normal(jax.random.PRNGKey(1), (B2, C, H2, W2), jnp.float32)
    out2 = jax.block_until_ready(scse_forward(x2, w1, b1, w2, b2, w_sp))
    ref2 = _reference(x2, w1, b1, w2, b2, w_sp)
    err2 = float(jnp.max(jnp.abs(out2 - ref2)))
    assert err2 < 1e-2, f"max abs err {err2}"

    print("KERNEL_OK")
</pallas_src>

<mosaic_0001>
module attributes {stable_mosaic.version = 11 : i64} {
  func.func @_scse_kernel(%arg0: i32, %arg1: memref<1x32x256xf32, #tpu.memory_space<vmem>>, %arg2: memref<2x32xf32, #tpu.memory_space<vmem>>, %arg3: memref<1x2xf32, #tpu.memory_space<vmem>>, %arg4: memref<2x32xf32, #tpu.memory_space<vmem>>, %arg5: memref<1x32xf32, #tpu.memory_space<vmem>>, %arg6: memref<32x1xf32, #tpu.memory_space<vmem>>, %arg7: memref<1x32x256xf32, #tpu.memory_space<vmem>>) attributes {dimension_semantics = [#tpu.dimension_semantics<parallel>], iteration_bounds = array<i64: 2>, scalar_prefetch = 0 : i64, scratch_operands = 0 : i64, tpu.core_type = #tpu.core_type<tc>, window_params = [{transform_indices = @transform_0, window_bounds = array<i64: 1, 32, 256>}, {pipeline_mode = #tpu.pipeline_mode<synchronous>, transform_indices = @transform_1, window_bounds = array<i64: 2, 32>}, {pipeline_mode = #tpu.pipeline_mode<synchronous>, transform_indices = @transform_2, window_bounds = array<i64: 1, 2>}, {pipeline_mode = #tpu.pipeline_mode<synchronous>, transform_indices = @transform_3, window_bounds = array<i64: 2, 32>}, {pipeline_mode = #tpu.pipeline_mode<synchronous>, transform_indices = @transform_4, window_bounds = array<i64: 1, 32>}, {pipeline_mode = #tpu.pipeline_mode<synchronous>, transform_indices = @transform_5, window_bounds = array<i64: 32, 1>}, {transform_indices = @transform_6, window_bounds = array<i64: 1, 32, 256>}]} {
    %c0 = arith.constant 0 : index
    %c0_0 = arith.constant 0 : index
    %c0_1 = arith.constant 0 : index
    %0 = vector.load %arg1[%c0, %c0_0, %c0_1] : memref<1x32x256xf32, #tpu.memory_space<vmem>>, vector<1x32x256xf32>
    %cst = arith.constant dense<0.000000e+00> : vector<1x32xf32>
    %1 = vector.multi_reduction <add>, %0, %cst [2] : vector<1x32x256xf32> to vector<1x32xf32>
    %cst_2 = arith.constant 3.906250e-03 : f32
    %2 = vector.broadcast %cst_2 : f32 to vector<1x32xf32>
    %3 = arith.mulf %1, %2 : vector<1x32xf32>
    %4 = vector.shape_cast %3 : vector<1x32xf32> to vector<1x1x32xf32>
    %c0_3 = arith.constant 0 : index
    %c0_4 = arith.constant 0 : index
    %5 = vector.load %arg2[%c0_3, %c0_4] : memref<2x32xf32, #tpu.memory_space<vmem>>, vector<2x32xf32>
    %6 = vector.shape_cast %5 : vector<2x32xf32> to vector<1x2x32xf32>
    %7 = vector.broadcast %4 : vector<1x1x32xf32> to vector<1x2x32xf32>
    %8 = arith.mulf %7, %6 : vector<1x2x32xf32>
    %cst_5 = arith.constant dense<0.000000e+00> : vector<1x2xf32>
    %9 = vector.multi_reduction <add>, %8, %cst_5 [2] : vector<1x2x32xf32> to vector<1x2xf32>
    %c0_6 = arith.constant 0 : index
    %c0_7 = arith.constant 0 : index
    %10 = vector.load %arg3[%c0_6, %c0_7] : memref<1x2xf32, #tpu.memory_space<vmem>>, vector<1x2xf32>
    %11 = arith.addf %9, %10 : vector<1x2xf32>
    %cst_8 = arith.constant 0.000000e+00 : f32
    %12 = vector.broadcast %cst_8 : f32 to vector<1x2xf32>
    %13 = arith.maximumf %11, %12 : vector<1x2xf32>
    %14 = vector.shape_cast %13 : vector<1x2xf32> to vector<1x2x1xf32>
    %c0_9 = arith.constant 0 : index
    %c0_10 = arith.constant 0 : index
    %15 = vector.load %arg4[%c0_9, %c0_10] : memref<2x32xf32, #tpu.memory_space<vmem>>, vector<2x32xf32>
    %16 = vector.shape_cast %15 : vector<2x32xf32> to vector<1x2x32xf32>
    %17 = vector.broadcast %14 : vector<1x2x1xf32> to vector<1x2x32xf32>
    %18 = arith.mulf %17, %16 : vector<1x2x32xf32>
    %cst_11 = arith.constant dense<0.000000e+00> : vector<1x32xf32>
    %19 = vector.multi_reduction <add>, %18, %cst_11 [1] : vector<1x2x32xf32> to vector<1x32xf32>
    %c0_12 = arith.constant 0 : index
    %c0_13 = arith.constant 0 : index
    %20 = vector.load %arg5[%c0_12, %c0_13] : memref<1x32xf32, #tpu.memory_space<vmem>>, vector<1x32xf32>
    %21 = arith.addf %19, %20 : vector<1x32xf32>
    %cst_14 = arith.constant 0.000000e+00 : f32
    %22 = vector.broadcast %cst_14 : f32 to vector<1x32xf32>
    %23 = arith.subf %22, %21 : vector<1x32xf32>
    %24 = math.exp %23 : vector<1x32xf32>
    %cst_15 = arith.constant 1.000000e+00 : f32
    %25 = vector.broadcast %cst_15 : f32 to vector<1x32xf32>
    %26 = arith.addf %25, %24 : vector<1x32xf32>
    %cst_16 = arith.constant 1.000000e+00 : f32
    %27 = vector.broadcast %cst_16 : f32 to vector<1x32xf32>
    %28 = arith.divf %27, %26 : vector<1x32xf32>
    %c0_17 = arith.constant 0 : index
    %c0_18 = arith.constant 0 : index
    %c0_19 = arith.constant 0 : index
    %29 = vector.load %arg1[%c0_17, %c0_18, %c0_19] : memref<1x32x256xf32, #tpu.memory_space<vmem>>, vector<1x32x256xf32>
    %c0_20 = arith.constant 0 : index
    %c0_21 = arith.constant 0 : index
    %30 = vector.load %arg6[%c0_20, %c0_21] : memref<32x1xf32, #tpu.memory_space<vmem>>, vector<32x1xf32>
    %31 = vector.shape_cast %30 : vector<32x1xf32> to vector<1x32x1xf32>
    %32 = vector.broadcast %31 : vector<1x32x1xf32> to vector<1x32x256xf32>
    %33 = arith.mulf %29, %32 : vector<1x32x256xf32>
    %cst_22 = arith.constant dense<0.000000e+00> : vector<1x256xf32>
    %34 = vector.multi_reduction <add>, %33, %cst_22 [1] : vector<1x32x256xf32> to vector<1x256xf32>
    %35 = vector.shape_cast %34 : vector<1x256xf32> to vector<1x1x256xf32>
    %cst_23 = arith.constant 0.000000e+00 : f32
    %36 = vector.broadcast %cst_23 : f32 to vector<1x1x256xf32>
    %37 = arith.subf %36, %35 : vector<1x1x256xf32>
    %38 = math.exp %37 : vector<1x1x256xf32>
    %cst_24 = arith.constant 1.000000e+00 : f32
    %39 = vector.broadcast %cst_24 : f32 to vector<1x1x256xf32>
    %40 = arith.addf %39, %38 : vector<1x1x256xf32>
    %41 = tpu.reciprocal %40 {approx = true} : vector<1x1x256xf32> -> vector<1x1x256xf32>
    %42 = vector.shape_cast %28 : vector<1x32xf32> to vector<1x32x1xf32>
    %43 = vector.broadcast %42 : vector<1x32x1xf32> to vector<1x32x256xf32>
    %44 = vector.broadcast %41 : vector<1x1x256xf32> to vector<1x32x256xf32>
    %45 = arith.addf %43, %44 : vector<1x32x256xf32>
    %c0_25 = arith.constant 0 : index
    %c0_26 = arith.constant 0 : index
    %c0_27 = arith.constant 0 : index
    %46 = vector.load %arg1[%c0_25, %c0_26, %c0_27] : memref<1x32x256xf32, #tpu.memory_space<vmem>>, vector<1x32x256xf32>
    %47 = arith.mulf %46, %45 : vector<1x32x256xf32>
    %c0_28 = arith.constant 0 : index
    %c0_29 = arith.constant 0 : index
    %c0_30 = arith.constant 0 : index
    %48 = vector.load %arg7[%c0_28, %c0_29, %c0_30] : memref<1x32x256xf32, #tpu.memory_space<vmem>>, vector<1x32x256xf32>
    tpu.vector_store %arg7[%c0_28, %c0_29, %c0_30], %47 {strides = array<i32>} : memref<1x32x256xf32, #tpu.memory_space<vmem>>, vector<1x32x256xf32>,
    return
  }
  func.func @transform_0(%arg0: i32) -> (i32, i32, i32) {
    %c0_i32 = arith.constant 0 : i32
    %c0_i32_0 = arith.constant 0 : i32
    %c0_i32_1 = arith.constant 0 : i32
    return %arg0, %c0_i32, %c0_i32_0 : i32, i32, i32
  }
  func.func @transform_1(%arg0: i32) -> (i32, i32) {
    %c0_i32 = arith.constant 0 : i32
    %c0_i32_0 = arith.constant 0 : i32
    %c0_i32_1 = arith.constant 0 : i32
    return %c0_i32, %c0_i32_0 : i32, i32
  }
  func.func @transform_2(%arg0: i32) -> (i32, i32) {
    %c0_i32 = arith.constant 0 : i32
    %c0_i32_0 = arith.constant 0 : i32
    %c0_i32_1 = arith.constant 0 : i32
    return %c0_i32, %c0_i32_0 : i32, i32
  }
  func.func @transform_3(%arg0: i32) -> (i32, i32) {
    %c0_i32 = arith.constant 0 : i32
    %c0_i32_0 = arith.constant 0 : i32
    %c0_i32_1 = arith.constant 0 : i32
    return %c0_i32, %c0_i32_0 : i32, i32
  }
  func.func @transform_4(%arg0: i32) -> (i32, i32) {
    %c0_i32 = arith.constant 0 : i32
    %c0_i32_0 = arith.constant 0 : i32
    %c0_i32_1 = arith.constant 0 : i32
    return %c0_i32, %c0_i32_0 : i32, i32
  }
  func.func @transform_5(%arg0: i32) -> (i32, i32) {
    %c0_i32 = arith.constant 0 : i32
    %c0_i32_0 = arith.constant 0 : i32
    %c0_i32_1 = arith.constant 0 : i32
    return %c0_i32, %c0_i32_0 : i32, i32
  }
  func.func @transform_6(%arg0: i32) -> (i32, i32, i32) {
    %c0_i32 = arith.constant 0 : i32
    %c0_i32_0 = arith.constant 0 : i32
    %c0_i32_1 = arith.constant 0 : i32
    return %arg0, %c0_i32, %c0_i32_0 : i32, i32, i32
  }
}

</mosaic_0001>

<bundles_post_ra>
// kernel: tpu_custom_call.1
= control target key start
LH: loop header
LB: loop body
LE: loop exit
PB: predicated region body
PF: predicated region fallthrough
CT: control target
= control target key end

     0   :  { %11 = vsyncpa [#allocation3], 0  ;;  %s1126_s0 = inlined_call_operand.hbm [shape: f32[2,32,256], index: 0, kind: input, shape index: {}]   ;;  %s1127_s1 = inlined_call_operand.vmem [shape: f32[2,32], index: 1, kind: input, shape index: {}]   ;;  %s1128_s2 = inlined_call_operand.vmem [shape: f32[1,2], index: 2, kind: input, shape index: {}]   ;;  %s1129_s3 = inlined_call_operand.vmem [shape: f32[2,32], index: 3, kind: input, shape index: {}]   ;;  %s1130_s4 = inlined_call_operand.vmem [shape: f32[1,32], index: 4, kind: input, shape index: {}]   ;;  %s1131_s5 = inlined_call_operand.vmem [shape: f32[32,1], index: 5, kind: input, shape index: {}]   ;;  %s1132_s6 = inlined_call_operand.hbm [shape: f32[2,32,256], index: 6, kind: output, shape index: {}]  }
   0x1   :  { %13 = vsyncpa [#allocation3 + $0x1], 0 }
   0x2   :  { %14 = vsyncpa [#allocation4], 0 }
   0x3   :  { %16 = vsyncpa [#allocation4 + $0x1], 0  ;;  %s904_s21 = smov 0   ;;  %s906_s22 = smov 0  }
   0x4   :  { %s908_s23 = smov 0   ;;  %s910_s24 = smov 0  }
   0x5 LB: > { %s925_s25 = sadd.s32 4294967295, %s862_s24   ;;  %s670_s26 = sadd.s32 4294967294, %s862_s24   ;;  %s862_s24 = sphi %s910_s24, %s1142_s24   ;;  %s858_s23 = sphi %s908_s23, %s1141_s23   ;;  %s854_s22 = sphi %s906_s22, %s1140_s22   ;;  %s850_s21 = sphi %s904_s21, %s1139_s21  }
   0x6   : > { %s929_s27 = sadd.s32 1, %s862_s24   ;;  %s29_s28 = sadd.s32 1, %s858_s23 }
   0x7   : > { %s26_s29 = ssub.s32 %s862_s24, %s929_s27  ;;  %p36_p0 = scmp.ne.s32.totalorder %s858_s23, %s854_s22 }
   0x8   : > { %p27_p1 = scmp.eq.s32.totalorder %s26_s29, 0  ;;  %p37_p2 = scmp.eq.s32.totalorder %s862_s24, 0 }
   0x9   : > { %p42_p3 = scmp.ne.s32.totalorder %s854_s22, %s850_s21  ;;  %p43_p4 = scmp.eq.s32.totalorder %s925_s25, 0 }
   0xa   : > { %s941_s30 = scalar_select %p27_p1, %s858_s23, %s29_s28  }
   0xb   : > { %p943_p5 = por %p37_p2, %p36_p0  ;;  %p947_p6 = por %p43_p4, %p42_p3 }
   0xc   : > { %p171_p7 = scmp.eq.s32.totalorder %s925_s25, 1  ;;  %p177_p8 = scmp.eq.s32.totalorder %s670_s26, 1 }
   0xd   : > { %p698_p10 = scmp.lt.s32.totalorder %s862_s24, 2  ;;  %s212_s11 = sand.u32 1, %s858_s23  }
   0xe   : > { %p954_p11 = por %p171_p7, %p36_p0  ;;  %p958_p12 = por %p177_p8, %p42_p3 }
   0xf   : > { %s684_s12 = sshll.u32 %s862_s24, 6  ;;  %s673_s13 = sshll.u32 %s212_s11, 6 }
  0x10   : > { %s221_s16 = scalar_lea.hbm %s1126_s0, %s684_s12  ;;  %s216_s18 = scalar_lea.vmem [#allocation2], %s673_s13 }
  0x11   : > { %s222_s17 = sshll.u32 %s221_s16, 4  ;;  %s224_s19 = sshll.u32 %s216_s18, 4  ;;  %s223_s17 = int_to_ptr.hbm [resolvable:$true] %s222_s17  ;;  %s225_s19 = int_to_ptr.vmem [resolvable:$true] %s224_s19 }
  0x12   : > { %p969_p13 = pnand %p698_p10, %p943_p5  ;;  %p676_p0 = scmp.ge.s32.totalorder %s862_s24, 1 }
  0x13   : > { %p232_p1 = scmp.lt.s32.totalorder %s862_s24, 3  ;;  %s213_s26 = scalar_lea.sflag [#allocation3], %s212_s11 }
  0x14   : > { %s766_s28 = sshra.s32 %s223_s17, 4  ;;  %p770_p3 = pneg %p969_p13  ;;  %s767_s28 = int_to_ptr.hbm [resolvable:$true] %s766_s28 }
  0x15   : > { %s768_s29 = scalar_lea.hbm %s767_s28, 64  ;;  %s773_s7 = scalar_lea.hbm %s1126_s0, 128 }
  0x16   : > { %p769_p2 = scmp.ne.s32.totalorder %s767_s28, %s768_s29  ;;  %p774_p5 = scmp.lt.s32.totalorder %s767_s28, %s1126_s0 }
  0x17   : > { %p775_p8 = scmp.lt.s32.totalorder %s773_s7, %s768_s29 }
  0x18   : > { %p771_p4 = pnand %p770_p3, %p769_p2 }
  0x19   : > { %p776_p10 = por %p775_p8, %p774_p5 }
  0x1a   : > { %p772_p7 = pneg %p771_p4 }
  0x1c   : > { %p777_p9 = pnand %p776_p10, %p772_p7 }
  0x1e   : > { %780 = shalt.err (!%p777_p9)
}
  0x1f   : > { %s864_s11 = smov 256   ;;  %s865_s16 = smov 16  }
  0x20   : > { %693 = dma.hbm_to_vmem [thread:$0]  (!%p969_p13), %s223_s17, 1024, %s225_s19, %s213_s26, %s864_s11, %s864_s11, %s865_s16  }
  0x21   : > { %p233_p2 = pnand %p676_p0, %p232_p1 }
  0x22   : > { %s990_s18 = sand.u32 (!%p233_p2), 1, %s854_s22  }
  0x23   : > { %236 = sbr.rel (%p233_p2) target bundleno = 754 (0x2f2), region = 44  ;;  %s677_s28 = sshll.u32 (!%p233_p2), %s990_s18, 6 }
  0x24   : > { %s239_s29 = scalar_lea.sflag (!%p233_p2), [#allocation3], %s990_s18  ;;  %s242_s12 = scalar_lea.vmem (!%p233_p2), [#allocation2], %s677_s28 }
  0x28   : > { %841 = dma.done.wait (%p947_p6), %s239_s29, 1024  }
  0x29   : > { %843 = vsyncadd (%p947_p6), %s239_s29, 4294966272  ;;  %v299_v0 = vlaneseq  ;;  %v1009_v3 = vld [vmem:[%s242_s12 + $0x20] sm:$0xff]  ;;  %v1011_v4 = vld [vmem:[%s242_s12 + $0x28] sm:$0xff]  ;;  %v866_v20 = vmov 0   ;;  %vm401_vm0 = vcmask 130112   ;;  %vm405_vm1 = vcmask 195712  }
  0x2a   : > { %v1013_v5 = vld [vmem:[%s242_s12] sm:$0xff]  ;;  %v286_v6 = vadd.f32 %v1011_v4, %v1009_v3  ;;  %v1017_v7 = vld [vmem:[%s242_s12 + $0x8] sm:$0xff]  ;;  %v1024_v11 = vld [vmem:[%s242_s12 + $0x30] sm:$0xff]  ;;  %vm409_vm2 = vcmask 261312   ;;  %vm418_vm3 = vcmask 1041409   ;;  %vm421_vm4 = vcmask 254976  }
  0x2b   : > { %v1001_v1 = vshrl.u32 %v299_v0, 7  ;;  %v296_v8 = vld [vmem:[%s1127_s1] sm:$0x3]  ;;  %v280_v9 = vadd.f32 %v1017_v7, %v1013_v5  ;;  %v1026_v12 = vld [vmem:[%s242_s12 + $0x38] sm:$0xff]  ;;  %v1028_v13 = vld [vmem:[%s242_s12 + $0x10] sm:$0xff]  ;;  %v397_v50 = vand.u32 127, %v299_v0 }
  0x2c   : > { %v298_v10 = vperm.slane %v296_v8, 0  ;;  %287 = vadd.xlane.f32.xlu1 %v286_v6  ;;  %v1030_v14 = vld [vmem:[%s242_s12 + $0x18] sm:$0xff]  ;;  %v289_v15 = vadd.f32 %v1026_v12, %v1024_v11  ;;  %v323_v18 = vperm.slane %v296_v8, 1  ;;  %v753_v45 = vld [vmem:[%s1128_s2] ss:$0 sm:$0xff]  ;;  %s271_s20 = scalar_lea.vmem [#allocation5], %s677_s28 }
  0x2d   : > { %737 = vset.pattern.permute.xlu2 %v1001_v1  ;;  %v1005_v2 = vadd.s32 8, %v1001_v1  ;;  %738 = vset.pattern.permute.xlu0 %v1001_v1  ;;  %v283_v16 = vadd.f32 %v1030_v14, %v1028_v13  ;;  %v1038_v17 = vadd.s32 16, %v1001_v1  ;;  %v1042_v19 = vadd.s32 24, %v1001_v1  ;;  %s685_s28 = sshll.u32 %s925_s25, 6  ;;  %s594_s14 = sshll.u32 %s271_s20, 4  ;;  %s595_s14 = int_to_ptr.vmem [resolvable:$true] %s594_s14 }
  0x2e   : > { %281 = vadd.xlane.f32.xlu0 %v280_v9  ;;  %v399_v52 = vadd.s32 4294967288, %v397_v50  ;;  %v407_v55 = vadd.s32 4294967272, %v397_v50  ;;  %v403_v56 = vadd.s32 4294967280, %v397_v50  ;;  %s593_s7 = scalar_lea.hbm %s1132_s6, %s685_s28  ;;  %s582_s11 = scalar_lea.sflag [#allocation4], %s990_s18 }
  0x2f   : > { %740 = vset.pattern.permute.xlu1 %v1005_v2  ;;  %s596_s15 = sshll.u32 %s593_s7, 4  ;;  %s816_s8 = scalar_lea.hbm %s1132_s6, 128  ;;  %s597_s15 = int_to_ptr.hbm [resolvable:$true] %s596_s15 }
  0x30   : > { %s810_s25 = sshra.s32 %s597_s15, 4  ;;  %s811_s25 = int_to_ptr.hbm [resolvable:$true] %s810_s25 }
  0x31   : > { %s812_s16 = scalar_lea.hbm %s811_s25, 64  ;;  %p817_p0 = scmp.lt.s32.totalorder %s811_s25, %s1132_s6 }
  0x32   : > { %p813_p6 = scmp.ne.s32.totalorder %s811_s25, %s812_s16  ;;  %p818_p1 = scmp.lt.s32.totalorder %s816_s8, %s812_s16 }
  0x34   : > { %290 = vadd.xlane.f32.xlu1 %v289_v15  ;;  %p814_p9 = pnand %p813_p6, %p954_p11  ;;  %p819_p3 = por %p818_p1, %p817_p0 }
  0x35   : > { %303 = vperm.xlu2 %737, %v298_v10  }
  0x36   : > { %284 = vadd.xlane.f32.xlu0 %v283_v16  ;;  %p815_p13 = pneg %p814_p9 }
  0x38   : > { %p820_p4 = pnand %p819_p3, %p815_p13 }
  0x3d   : > { %739 = vset.pattern.permute.xlu2 %v1005_v2 }
  0x45   : > { %309 = vperm.xlu2 %739, %v298_v10  }
  0x4a   : > { %328 = vperm.xlu0 %738, %v323_v18  }
  0x4d   : > { %741 = vset.pattern.permute.xlu2 %v1038_v17  ;;  %334 = vperm.xlu1 %740, %v323_v18  }
  0x52   : > { %745 = vset.pattern.permute.xlu0 %v866_v20 }
  0x55   : > { %315 = vperm.xlu2 %741, %v298_v10   ;;  %743 = vset.pattern.permute.xlu1 %v866_v20 }
  0x5d   : > { %340 = vperm.xlu2 %741, %v323_v18  }
  0x65   : > { %742 = vset.pattern.permute.xlu2 %v1042_v19 }
  0x6d   : > { %321 = vperm.xlu2 %742, %v298_v10  }
  0x75   : > { %346 = vperm.xlu2 %742, %v323_v18  }
  0x7d   : > { %744 = vset.pattern.permute.xlu2 %v866_v20 }
  0x8f   : > { %v304_v21 = vpop.permute.xlu2 %303 }
  0x9f   : > { %v310_v25 = vpop.permute.xlu2 %309  ;;  %v288_v29 = vpop.xlane.xlu1 %287 }
  0xa0   : > { %v294_v31 = vmul.f32 0.00390625, %v288_v29  ;;  %v475_v29 = vld [vmem:[%s1131_s5 + $0x18] sm:$0xff] }
  0xa1   : > { %v282_v22 = vpop.xlane.xlu0 %281 }
  0xa2   : > { %v292_v23 = vmul.f32 0.00390625, %v282_v22  ;;  %v472_v22 = vld [vmem:[%s1131_s5] sm:$0xff] }
  0xa4   : > { %v356_v24 = vmul.f32 %v304_v21, %v292_v23 }
  0xa6   : > { %373 = vperm.xlu1 %743, %v356_v24  }
  0xa7   : > { %v291_v33 = vpop.xlane.xlu1 %290 }
  0xa8   : > { %v295_v37 = vmul.f32 0.00390625, %v291_v33 }
  0xa9   : > { %v285_v26 = vpop.xlane.xlu0 %284 }
  0xaa   : > { %v293_v27 = vmul.f32 0.00390625, %v285_v26 }
  0xac   : > { %v357_v28 = vmul.f32 %v310_v25, %v293_v27 }
  0xae   : > { %376 = vperm.xlu2 %744, %v357_v28   ;;  %v473_v28 = vld [vmem:[%s1131_s5 + $0x8] sm:$0xff] }
  0xaf   : > { %v316_v30 = vpop.permute.xlu2 %315 }
  0xb0   : > { %v358_v32 = vmul.f32 %v316_v30, %v294_v31  ;;  %v437_v30 = vld [vmem:[%s1129_s3] sm:$0x3] }
  0xb6   : > { %379 = vperm.xlu2 %744, %v358_v32  }
  0xb7   : > { %v341_v34 = vpop.permute.xlu2 %340 }
  0xb8   : > { %v362_v42 = vmul.f32 %v341_v34, %v294_v31 }
  0xbc   : > { %v329_v35 = vpop.permute.xlu0 %328 }
  0xbd   : > { %v360_v36 = vmul.f32 %v329_v35, %v292_v23  ;;  %v474_v23 = vld [vmem:[%s1131_s5 + $0x10] sm:$0xff] }
  0xbf   : > { %385 = vperm.xlu1 %743, %v360_v36   ;;  %v335_v38 = vpop.permute.xlu1 %334 }
  0xc0   : > { %v361_v39 = vmul.f32 %v335_v38, %v293_v27  ;;  %v451_v38 = vld [vmem:[%s1130_s4] sm:$0x1] }
  0xc2   : > { %388 = vperm.xlu0 %745, %v361_v39  }
  0xc7   : > { %v322_v40 = vpop.permute.xlu2 %321  ;;  %391 = vperm.xlu1 %743, %v362_v42  }
  0xc8   : > { %v359_v41 = vmul.f32 %v322_v40, %v295_v37 }
  0xca   : > { %382 = vperm.xlu2 %744, %v359_v41   ;;  %752 = vset.pattern.permute.xlu0 %v1042_v19 }
  0xcf   : > { %v347_v43 = vpop.permute.xlu2 %346 }
  0xd0   : > { %v363_v44 = vmul.f32 %v347_v43, %v295_v37 }
  0xd2   : > { %746 = vset.pattern.permute.xlu2 %v1001_v1  ;;  %394 = vperm.xlu1 %743, %v363_v44  }
  0xda   : > { %432 = vperm.xlu2 %746, %v753_v45  }
  0xe2   : > { %747 = vset.pattern.permute.xlu2 %v866_v20 }
  0xe3   : > { %478 = vperm.xlu2 %747, %v472_v22  }
  0xeb   : > { %488 = vperm.xlu2 %747, %v474_v23  }
  0xf3   : > { %748 = vset.pattern.permute.xlu2 %v1001_v1 }
 0x108   : > { %v377_v47 = vpop.permute.xlu2 %376 }
 0x109   : > { %v400_v58 = vperm.slane %v377_v47, %v399_v52 }
 0x110   : > { %v380_v49 = vpop.permute.xlu2 %379 }
 0x111   : > { %v404_v6 = vperm.slane %v380_v49, %v403_v56 }
 0x118   : > { %v374_v46 = vpop.permute.xlu1 %373 }
 0x119   : > { %v398_v54 = vperm.slane %v374_v46, %v397_v50 }
 0x11b   : > { %v402_v61 = vsel %vm401_vm0, %v400_v58, %v398_v54 }
 0x11c   : > { %v406_v15 = vsel %vm405_vm1, %v404_v6, %v402_v61 }
 0x124   : > { %v383_v57 = vpop.permute.xlu2 %382 }
 0x125   : > { %v408_v62 = vperm.slane %v383_v57, %v407_v55 }
 0x127   : > { %v410_v16 = vsel %vm409_vm2, %v408_v62, %v406_v15 }
 0x131   : > { %v386_v48 = vpop.permute.xlu1 %385 }
 0x132   : > { %v411_v63 = vperm.slane %v386_v48, %v397_v50 }
 0x134   : > { %v389_v53 = vpop.permute.xlu0 %388  ;;  %v433_v24 = vpop.permute.xlu2 %432 }
 0x135   : > { %v412_v59 = vperm.slane %v389_v53, %v399_v52 }
 0x137   : > { %v413_v9 = vsel %vm401_vm0, %v412_v59, %v411_v63 }
 0x139   : > { %v392_v51 = vpop.permute.xlu1 %391 }
 0x13a   : > { %v414_v60 = vperm.slane %v392_v51, %v403_v56 }
 0x13c   : > { %v415_v10 = vsel %vm405_vm1, %v414_v60, %v413_v9 }
 0x144   : > { %v395_v8 = vpop.permute.xlu1 %394 }
 0x145   : > { %v416_v0 = vperm.slane %v395_v8, %v407_v55  ;;  %v479_v55 = vpop.permute.xlu2 %478 }
 0x146   : > { %v496_v57 = vmul.f32 %v479_v55, %v1013_v5  ;;  %v497_v59 = vmul.f32 %v479_v55, %v1017_v7 }
 0x147   : > { %v417_v18 = vsel %vm409_vm2, %v416_v0, %v415_v10 }
 0x148   : > { %v419_v20 = vsel %vm418_vm3, %v417_v18, %v410_v16 }
 0x149   : > { %v422_v21 = vsel %vm421_vm4, %v419_v20, 0.0 }
 0x14a   : > { %423 = vadd.xlane.f32.xlu0 %v422_v21 }
 0x14d   : > { %v489_v61 = vpop.permute.xlu2 %488 }
 0x14e   : > { %v500_v6 = vmul.f32 %v489_v61, %v1009_v3 }
 0x1bd   : > { %v424_v25 = vpop.xlane.xlu0 %423 }
 0x1be   : > { %v435_v26 = vadd.f32 %v433_v24, %v424_v25 }
 0x1c0   : > { %v436_v27 = vmax.f32 %v435_v26, 0.0 }
 0x1c2   : > { %440 = vperm.xlu1 %743, %v436_v27  }
 0x1ca   : > { %483 = vperm.xlu1 %743, %v473_v28  }
 0x1d2   : > { %493 = vperm.xlu1 %743, %v475_v29  }
 0x1da   : > { %749 = vset.pattern.permute.xlu1 %v1005_v2 }
 0x234   : > { %v441_v31 = vpop.permute.xlu1 %440 }
 0x235   : > { %v443_v32 = vmul.f32 %v441_v31, %v437_v30 }
 0x237   : > { %v444_v1 = vsel %vm421_vm4, %v443_v32, 0.0 }
 0x238   : > { %v445_v33 = vrot.slane %v444_v1, 4 }
 0x23a   : > { %v446_v34 = vadd.f32 %v445_v33, %v444_v1 }
 0x23c   : > { %v447_v35 = vrot.slane %v446_v34, 2  ;;  %v484_v56 = vpop.permute.xlu1 %483 }
 0x23d   : > { %v498_v58 = vmul.f32 %v484_v56, %v1028_v13  ;;  %v499_v60 = vmul.f32 %v484_v56, %v1030_v14 }
 0x23e   : > { %v448_v36 = vadd.f32 %v447_v35, %v446_v34 }
 0x23f   : > { %v504_v63 = vadd.f32 %v498_v58, %v496_v57 }
 0x240   : > { %v449_v37 = vrot.slane %v448_v36, 1 }
 0x241   : > { %v505_v0 = vadd.f32 %v504_v63, %v500_v6 }
 0x242   : > { %v450_v39 = vadd.f32 %v449_v37, %v448_v36 }
 0x244   : > { %v452_v40 = vadd.f32 %v451_v38, %v450_v39  ;;  %v494_v62 = vpop.permute.xlu1 %493 }
 0x245   : > { %v502_v8 = vmul.f32 %v494_v62, %v1024_v11  ;;  %v503_v9 = vmul.f32 %v494_v62, %v1026_v12 }
 0x246   : > { %v453_v2 = vsub.f32 0.0, %v452_v40 }
 0x247   : > { %v506_v15 = vadd.f32 %v505_v0, %v502_v8 }
 0x248   : > { %v454_v41 = vmul.f32 1.442695, %v453_v2 }
 0x249   : > { %v507_v18 = vrot.slane %v506_v15, 4 }
 0x24a   : > { %754 = vpow2.f32 %v454_v41 }
 0x24b   : > { %v508_v21 = vadd.f32 %v507_v18, %v506_v15 }
 0x24d   : > { %v509_v23 = vrot.slane %v508_v21, 2 }
 0x24f   : > { %v510_v25 = vadd.f32 %v509_v23, %v508_v21 }
 0x250   : > { %v755_v42 = vpop.eup %754 }
 0x251   : > { %v456_v43 = vadd.f32 1.0, %v755_v42  ;;  %v511_v27 = vrot.slane %v510_v25, 1 }
 0x253   : > { %756 = vrcp.f32 %v456_v43  ;;  %v468_v47 = vand.u32 2147483648, %v456_v43  ;;  %v466_v49 = vand.u32 2147483647, %v456_v43  ;;  %vm462_vm6 = vweird.f32 %v456_v43 }
 0x254   : > { %v512_v29 = vadd.f32 %v511_v27, %v510_v25 }
 0x255   : > { %v469_v51 = vor.u32 1.1754944e-38, %v468_v47  ;;  %vm467_vm8 = vcmp.eq.f32.partialorder %v466_v49, 8.507059e+37 }
 0x256   : > { %v522_v31 = vsub.f32 0.0, %v512_v29 }
 0x258   : > { %v524_v1 = vmul.f32 1.442695, %v522_v31 }
 0x259   : > { %v757_v44 = vpop.eup %756 }
 0x25a   : > { %v458_v45 = vmul.f32 %v757_v44, %v456_v43  ;;  %vm463_vm5 = vweird.f32 %v757_v44  ;;  %758 = vpow2.f32 %v524_v1 }
 0x25b   : > { %vm464_vm7 = vmor %vm462_vm6, %vm463_vm5 }
 0x25c   : > { %v459_v46 = vsub.f32 1.0, %v458_v45 }
 0x25e   : > { %v460_v48 = vmul.f32 %v757_v44, %v459_v46 }
 0x260   : > { %v461_v50 = vadd.f32 %v757_v44, %v460_v48  ;;  %v759_v34 = vpop.eup %758 }
 0x261   : > { %v528_v36 = vadd.f32 1.0, %v759_v34 }
 0x262   : > { %v465_v52 = vsel %vm464_vm7, %v757_v44, %v461_v50 }
 0x263   : > { %v470_v53 = vsel %vm467_vm8, %v469_v51, %v465_v52 }
 0x264   : > { %v532_v54 = vperm.slane %v470_v53, 0 }
 0x266   : > { %543 = vperm.xlu1 %749, %v532_v54   ;;  %537 = vperm.xlu2 %748, %v532_v54  }
 0x26e   : > { %751 = vset.pattern.permute.xlu1 %v1042_v19  ;;  %750 = vset.pattern.permute.xlu2 %v1038_v17  ;;  %v513_v19 = vadd.f32 %v499_v60, %v497_v59  ;;  %v501_v17 = vmul.f32 %v489_v61, %v1011_v4 }
 0x270   : > { %v514_v10 = vadd.f32 %v513_v19, %v501_v17 }
 0x272   : > { %v515_v16 = vadd.f32 %v514_v10, %v503_v9 }
 0x274   : > { %v516_v20 = vrot.slane %v515_v16, 4 }
 0x276   : > { %555 = vperm.xlu1 %751, %v532_v54   ;;  %549 = vperm.xlu2 %750, %v532_v54   ;;  %v517_v22 = vadd.f32 %v516_v20, %v515_v16 }
 0x278   : > { %v518_v24 = vrot.slane %v517_v22, 2 }
 0x27a   : > { %v519_v26 = vadd.f32 %v518_v24, %v517_v22 }
 0x27c   : > { %v520_v28 = vrot.slane %v519_v26, 1 }
 0x27e   : > { %v521_v30 = vadd.f32 %v520_v28, %v519_v26 }
 0x280   : > { %v523_v32 = vsub.f32 0.0, %v521_v30 }
 0x282   : > { %v526_v33 = vmul.f32 1.442695, %v523_v32 }
 0x284   : > { %760 = vpow2.f32 %v526_v33 }
 0x285   : > { %762 = vrcp.f32 %v528_v36 }
 0x28a   : > { %v761_v35 = vpop.eup %760 }
 0x28b   : > { %v529_v37 = vadd.f32 1.0, %v761_v35  ;;  %v763_v38 = vpop.eup %762 }
 0x28d   : > { %764 = vrcp.f32 %v529_v37 }
 0x293   : > { %v765_v39 = vpop.eup %764 }
 0x2c0   : > { %v538_v40 = vpop.permute.xlu2 %537 }
 0x2c1   : > { %v557_v2 = vadd.f32 %v763_v38, %v538_v40  ;;  %v558_v41 = vadd.f32 %v765_v39, %v538_v40 }
 0x2c3   : > { %v565_v42 = vmul.f32 %v557_v2, %v1013_v5  ;;  %v566_v43 = vmul.f32 %v558_v41, %v1017_v7 }
 0x2c5   : > { %573 = vst [vmem:[%s271_s20] sm:$0xff] %v565_v42 }
 0x2c6   : > { %574 = vst [vmem:[%s271_s20 + $0x8] sm:$0xff] %v566_v43 }
 0x2d0   : > { %v550_v44 = vpop.permute.xlu2 %549 }
 0x2d1   : > { %v561_v45 = vadd.f32 %v763_v38, %v550_v44  ;;  %v562_v46 = vadd.f32 %v765_v39, %v550_v44 }
 0x2d3   : > { %v569_v47 = vmul.f32 %v561_v45, %v1009_v3  ;;  %v570_v48 = vmul.f32 %v562_v46, %v1011_v4 }
 0x2d5   : > { %577 = vst [vmem:[%s271_s20 + $0x20] sm:$0xff] %v569_v47 }
 0x2d6   : > { %578 = vst [vmem:[%s271_s20 + $0x28] sm:$0xff] %v570_v48 }
 0x2d8   : > { %v544_v49 = vpop.permute.xlu1 %543 }
 0x2d9   : > { %v559_v50 = vadd.f32 %v763_v38, %v544_v49  ;;  %v560_v51 = vadd.f32 %v765_v39, %v544_v49 }
 0x2db   : > { %v567_v5 = vmul.f32 %v559_v50, %v1028_v13  ;;  %v568_v7 = vmul.f32 %v560_v51, %v1030_v14 }
 0x2dd   : > { %575 = vst [vmem:[%s271_s20 + $0x10] sm:$0xff] %v567_v5 }
 0x2de   : > { %576 = vst [vmem:[%s271_s20 + $0x18] sm:$0xff] %v568_v7 }
 0x2e8   : > { %v556_v3 = vpop.permute.xlu1 %555 }
 0x2e9   : > { %v563_v4 = vadd.f32 %v763_v38, %v556_v3  ;;  %v564_v52 = vadd.f32 %v765_v39, %v556_v3 }
 0x2eb   : > { %v571_v53 = vmul.f32 %v563_v4, %v1024_v11  ;;  %v572_v13 = vmul.f32 %v564_v52, %v1026_v12 }
 0x2ed   : > { %579 = vst [vmem:[%s271_s20 + $0x30] sm:$0xff] %v571_v53 }
 0x2ee   : > { %580 = vst [vmem:[%s271_s20 + $0x38] sm:$0xff] %v572_v13 }
 0x2ef   : > { %823 = shalt.err (!%p820_p4)
}
 0x2f0   : > { %s867_s18 = smov 256   ;;  %s868_s20 = smov 16  }
 0x2f1   : > { %688 = dma.vmem_to_hbm [thread:$0]  (%p954_p11), %s595_s14, 1024, %s597_s15, %s582_s11, %s867_s18, %s867_s18, %s868_s20  }
 0x2f2 PF: > { %s611_s28 = sand.u32 1, %s850_s21   ;;  %p1138_p7 = scmp.ge.s32.totalorder %s862_s24, 2 }
 0x2f3   : > { %s612_s26 = scalar_lea.sflag [#allocation4], %s611_s28 }
 0x2f4   : > { %p695_p5 = pnand %p1138_p7, %p958_p12 }
 0x2f6   : > { %p696_p8 = pneg %p695_p5 }
 0x2f8   : > { %845 = dma.done.wait (%p696_p8), %s612_s26, 1024  }
 0x2f9   : > { %847 = vsyncadd (%p696_p8), %s612_s26, 4294966272  ;;  %p19_p10 = scmp.ge.s32.totalorder %s929_s27, 4   ;;  %s1139_s21 = smov %s854_s22 }
 0x2fa   : > { %s1140_s22 = smov %s858_s23  ;;  %s1141_s23 = smov %s941_s30 }
 0x2fb   : > { %s1142_s24 = smov %s929_s27  ;;  %21 = sbr.rel (!%p19_p10) target bundleno = 5 (0x5), region = 89 }
 0x300   :  { %618 = vsyncpa [#allocation3], 1 }
 0x301   :  { %620 = vsyncpa [#allocation3 + $0x1], 1 }
 0x302   :  { %621 = vsyncpa [#allocation4], 1 }
 0x303   :  { %623 = vsyncpa [#allocation4 + $0x1], 1 }

</bundles_post_ra>
